<compile_context>
chip_gen: v6e
topology: v6e:2x2x1
jax: 0.10.0
libtpu: 0.0.40
codegen_flags: <defaults>
</compile_context>

<pallas_src>
import math
import functools

import jax
import jax.numpy as jnp
from jax import lax
from jax.experimental import pallas as pl
from jax.experimental.pallas import tpu as pltpu


# ---------------------------------------------------------------------------
# Helpers
# ---------------------------------------------------------------------------

def _pick_tile(dim, target):
    """Largest tile <= target dividing dim (whole dim if dim <= target)."""
    if dim <= target:
        return dim
    t = target
    while dim % t != 0 and t > 1:
        t //= 2
    return t


# ---------------------------------------------------------------------------
# Tiled matmul: (M, K) @ (K, N) -> (M, N), f32 accumulation
# ---------------------------------------------------------------------------

def _matmul_kernel(x_ref, w_ref, o_ref, acc_ref):
    @pl.when(pl.program_id(2) == 0)
    def _():
        acc_ref[...] = jnp.zeros(acc_ref.shape, acc_ref.dtype)

    acc_ref[...] += jnp.dot(
        x_ref[...], w_ref[...], preferred_element_type=jnp.float32
    )

    @pl.when(pl.program_id(2) == pl.num_programs(2) - 1)
    def _():
        o_ref[...] = acc_ref[...].astype(o_ref.dtype)


def pallas_matmul(x, w_t, *, bm=256, bn=256, bk=512):
    """x: (M, K), w_t: (K, N) -> (M, N). Tiled, double-buffered, K-reduced."""
    M, K = x.shape
    K2, N = w_t.shape
    assert K == K2
    tm, tn, tk = _pick_tile(M, bm), _pick_tile(N, bn), _pick_tile(K, bk)
    grid = (M // tm, N // tn, K // tk)
    return pl.pallas_call(
        _matmul_kernel,
        out_shape=jax.ShapeDtypeStruct((M, N), x.dtype),
        grid_spec=pltpu.PrefetchScalarGridSpec(
            num_scalar_prefetch=0,
            grid=grid,
            in_specs=[
                pl.BlockSpec((tm, tk), lambda i, j, k: (i, k)),
                pl.BlockSpec((tk, tn), lambda i, j, k: (k, j)),
            ],
            out_specs=pl.BlockSpec((tm, tn), lambda i, j, k: (i, j)),
            scratch_shapes=[pltpu.VMEM((tm, tn), jnp.float32)],
        ),
        compiler_params=pltpu.CompilerParams(
            dimension_semantics=("parallel", "parallel", "arbitrary"),
            vmem_limit_bytes=48 * 1024 * 1024,  # safe on v7x (64 MiB physical)
        ),
    )(x, w_t)


# ---------------------------------------------------------------------------
# Flash-style causal attention
#   inputs: q, k, v of shape (Nb, S, H*D)  (heads packed along the last dim)
#   grid = (Nb, H, S//tq, S//tk), BlockSpec index_map slices the head.
# ---------------------------------------------------------------------------

def _flash_attn_kernel(q_ref, k_ref, v_ref, o_ref, m_sc, l_sc, acc_sc,
                       *, scale, tq, tk):
    qi = pl.program_id(2)
    ki = pl.program_id(3)
    nk = pl.num_programs(3)

    @pl.when(ki == 0)
    def _():
        m_sc[...] = jnp.full(m_sc.shape, -jnp.inf, dtype=m_sc.dtype)
        l_sc[...] = jnp.zeros(l_sc.shape, l_sc.dtype)
        acc_sc[...] = jnp.zeros(acc_sc.shape, acc_sc.dtype)

    def _process(masked):
        # Fold 1/sqrt(D) into q once per tile (tq*D mults, not tq*tk).
        # No f32 upcast of MXU inputs: dot accumulates in f32 regardless.
        q = q_ref[0] * scale
        s = jnp.dot(q, k_ref[0].T, preferred_element_type=jnp.float32)
        if masked:
            # Diagonal tile only (tq == tk, so local indices suffice).
            row = lax.broadcasted_iota(jnp.int32, (tq, tk), 0)
            col = lax.broadcasted_iota(jnp.int32, (tq, tk), 1)
            s = jnp.where(col <= row, s, -1e30)
        m_prev = m_sc[...]
        m_new = jnp.maximum(m_prev, jnp.max(s, axis=-1, keepdims=True))
        alpha = jnp.exp(m_prev - m_new)
        p = jnp.exp(s - m_new)
        l_sc[...] = alpha * l_sc[...] + jnp.sum(p, axis=-1, keepdims=True)
        acc_sc[...] = alpha * acc_sc[...] + jnp.dot(
            p.astype(v_ref.dtype), v_ref[0], preferred_element_type=jnp.float32
        )
        m_sc[...] = m_new

    # Causal block skipping: only lower-triangular tile pairs do any compute.
    @pl.when(ki < qi)
    def _():
        _process(masked=False)

    @pl.when(ki == qi)
    def _():
        _process(masked=True)

    @pl.when(ki == nk - 1)
    def _():
        inv_l = pl.reciprocal(l_sc[...], approx=True)  # EUP slot, frees VALU
        o_ref[0] = (acc_sc[...] * inv_l).astype(o_ref.dtype)


def pallas_flash_attention(q, k, v, head_dim, *, block_q=128, block_k=128):
    """q, k, v: (Nb, S, H*head_dim). Causal, scale = 1/sqrt(head_dim)."""
    Nb, S, Dl = q.shape
    assert Dl % head_dim == 0
    H = Dl // head_dim
    tq = _pick_tile(S, block_q)
    tk = tq  # equal q/k tiles keep the causal block logic trivial
    nq, nk = S // tq, S // tk

    q_spec = pl.BlockSpec((1, tq, head_dim), lambda b, h, qi, ki: (b, qi, h))
    kv_spec = pl.BlockSpec((1, tk, head_dim), lambda b, h, qi, ki: (b, ki, h))
    o_spec = pl.BlockSpec((1, tq, head_dim), lambda b, h, qi, ki: (b, qi, h))

    kernel = functools.partial(
        _flash_attn_kernel, scale=1.0 / math.sqrt(head_dim), tq=tq, tk=tk
    )
    return pl.pallas_call(
        kernel,
        out_shape=jax.ShapeDtypeStruct(q.shape, q.dtype),
        grid_spec=pltpu.PrefetchScalarGridSpec(
            num_scalar_prefetch=0,
            grid=(Nb, H, nq, nk),
            in_specs=[q_spec, kv_spec, kv_spec],
            out_specs=o_spec,
            scratch_shapes=[
                pltpu.VMEM((tq, 1), jnp.float32),        # running max
                pltpu.VMEM((tq, 1), jnp.float32),        # running sum
                pltpu.VMEM((tq, head_dim), jnp.float32),  # output accumulator
            ],
        ),
        compiler_params=pltpu.CompilerParams(
            dimension_semantics=("parallel", "parallel", "parallel", "arbitrary"),
            vmem_limit_bytes=48 * 1024 * 1024,
        ),
    )(q, k, v)


# ---------------------------------------------------------------------------
# Interleaved rotary embedding (pairwise reshape, no even/odd strided slices)
# TODO(synk): fuse rotary into the flash kernel (cos/sin tiles + pltpu.roll)
#             to remove the extra HBM round trip between projection and attn.
# ---------------------------------------------------------------------------

def apply_rotary_interleaved(x, seqlen_offset=0, base=10000.0):
    """x: (B, S, H, D). Interleaved rotary (adjacent-dim pairs)."""
    B, S, H, D = x.shape
    inv_freq = 1.0 / (base ** (jnp.arange(0, D, 2, dtype=jnp.float32) / D))
    t = jnp.arange(seqlen_offset, seqlen_offset + S, dtype=jnp.float32)
    freqs = jnp.outer(t, inv_freq)                         # (S, D/2)
    cos = jnp.cos(freqs)[None, :, None, :, None]           # (1,S,1,D/2,1)
    sin = jnp.sin(freqs)[None, :, None, :, None]
    xp = x.reshape(B, S, H, D // 2, 2).astype(jnp.float32)
    x1 = xp[..., 0:1]
    x2 = xp[..., 1:2]
    o1 = x1 * cos - x2 * sin
    o2 = x1 * sin + x2 * cos
    out = jnp.concatenate([o1, o2], axis=-1).reshape(B, S, H, D)
    return out.astype(x.dtype)


# ---------------------------------------------------------------------------
# Attention module (forward pass, no-KV-cache / integer batch_info path)
# ---------------------------------------------------------------------------

class AttentionParams:
    def __init__(self, key, dim, n_heads):
        self.dim = dim
        self.n_heads = n_heads
        self.head_dim = dim // n_heads
        k1, k2, k3 = jax.random.split(key, 3)
        s = 1.0 / math.sqrt(dim)
        # PyTorch Linear weight layout: (out_features, in_features)
        self.wqk = jax.random.uniform(k1, (2 * dim, dim), jnp.float32, -s, s)
        self.wv = jax.random.uniform(k2, (dim, dim), jnp.float32, -s, s)
        self.wo = jax.random.uniform(k3, (dim, dim), jnp.float32, -s, s)
        # Fused QKV weight (one GEMM => x is streamed from HBM once).
        self.w_qkv_t = jnp.concatenate([self.wqk, self.wv], axis=0).T  # (dim, 3*dim)
        self.wo_t = self.wo.T                                          # (H*D, dim)


def attention_forward(params: AttentionParams, x):
    """x: (bsz, seqlen, dim). Equivalent to Attention.forward with
    cache_info=(0,-1,1), integer batch_info, layer_id != 59.
    (_remove_padding is identity for integer batch_info; KV-cache branches and
    split_and_pad are not exercised on this path.)"""
    bsz, seqlen, dim = x.shape
    H, D = params.n_heads, params.head_dim

    x2d = x.reshape(bsz * seqlen, dim)

    # Fused QK+V projection (tiled Pallas GEMM).
    qkv = pallas_matmul(x2d, params.w_qkv_t)               # (B*S, 3*H*D)
    xqk = qkv[:, : 2 * H * D].reshape(bsz, seqlen, 2, H, D)
    xv = qkv[:, 2 * H * D:].reshape(bsz, seqlen, H, D)

    # Rotary (interleaved) on q and k.
    xq = apply_rotary_interleaved(xqk[:, :, 0], seqlen_offset=0)
    xk = apply_rotary_interleaved(xqk[:, :, 1], seqlen_offset=0)

    if D % 128 == 0:
        # Lane-dense per-head blocks sliced straight out of (B, S, H*D) by the
        # BlockSpec index_map -- no (B,S,H,D)->(B,H,S,D) transposes, and the
        # output is already in the layout wo expects.
        q = xq.reshape(bsz, seqlen, H * D)
        k = xk.reshape(bsz, seqlen, H * D)
        v = xv.reshape(bsz, seqlen, H * D)
        o = pallas_flash_attention(q, k, v, head_dim=D)     # (B, S, H*D)
        out2d = o.reshape(bsz * seqlen, H * D)
    else:
        # Fallback for head_dim not lane-dense: per-(batch,head) layout.
        def to_bh(t):
            return jnp.transpose(t, (0, 2, 1, 3)).reshape(bsz * H, seqlen, D)
        o = pallas_flash_attention(to_bh(xq), to_bh(xk), to_bh(xv), head_dim=D)
        o = jnp.transpose(o.reshape(bsz, H, seqlen, D), (0, 2, 1, 3))
        out2d = o.reshape(bsz * seqlen, H * D)

    # Output projection.
    y = pallas_matmul(out2d, params.wo_t)                   # (B*S, dim)
    return y.reshape(bsz, seqlen, dim)


# ---------------------------------------------------------------------------
# Pure-JAX reference for verification
# ---------------------------------------------------------------------------

def attention_reference(params: AttentionParams, x):
    bsz, seqlen, dim = x.shape
    H, D = params.n_heads, params.head_dim
    xqk = (x @ params.wqk.T).reshape(bsz, seqlen, 2, H, D)
    xv = (x @ params.wv.T).reshape(bsz, seqlen, H, D)
    xq = apply_rotary_interleaved(xqk[:, :, 0])
    xk = apply_rotary_interleaved(xqk[:, :, 1])
    q = jnp.transpose(xq, (0, 2, 1, 3))
    k = jnp.transpose(xk, (0, 2, 1, 3))
    v = jnp.transpose(xv, (0, 2, 1, 3))
    s = jnp.einsum("bhqd,bhkd->bhqk", q, k) / math.sqrt(D)
    mask = jnp.tril(jnp.ones((seqlen, seqlen), dtype=bool))
    s = jnp.where(mask[None, None], s, -jnp.inf)
    p = jax.nn.softmax(s, axis=-1)
    o = jnp.einsum("bhqk,bhkd->bhqd", p, v)
    o = jnp.transpose(o, (0, 2, 1, 3)).reshape(bsz, seqlen, H * D)
    return o @ params.wo.T


# ---------------------------------------------------------------------------
# Main
# ---------------------------------------------------------------------------

if __name__ == "__main__":
    key = jax.random.PRNGKey(0)
    kp, kx = jax.random.split(key)

    # Small but TPU-tile-friendly shapes: head_dim=128 (lane-dense), seqlen=256
    # so the flash grid is 2x2 q/kv tiles and exercises causal block skipping.
    dim, n_heads = 256, 2
    bsz, seqlen = 2, 256

    params = AttentionParams(kp, dim=dim, n_heads=n_heads)
    x = jax.random.normal(kx, (bsz, seqlen, dim), dtype=jnp.float32)

    out = attention_forward(params, x)
    out = jax.block_until_ready(out)

    ref = attention_reference(params, x)
    assert out.shape == (bsz, seqlen, dim)
    # Tolerance accounts for online-softmax accumulation order and the EUP
    # approx reciprocal (<~0.5% relative); real bugs would be O(1) off.
    assert jnp.allclose(out, ref, atol=5e-2, rtol=5e-2), "mismatch vs reference"

    print("KERNEL_OK")
</pallas_src>

<mosaic_0001>
module attributes {stable_mosaic.version = 11 : i64} {
  func.func @_matmul_kernel(%arg0: i32, %arg1: i32, %arg2: i32, %arg3: memref<256x256xf32, #tpu.memory_space<vmem>>, %arg4: memref<256x256xf32, #tpu.memory_space<vmem>>, %arg5: memref<256x256xf32, #tpu.memory_space<vmem>>, %arg6: memref<256x256xf32, #tpu.memory_space<vmem>>) attributes {dimension_semantics = [#tpu.dimension_semantics<parallel>, #tpu.dimension_semantics<parallel>, #tpu.dimension_semantics<arbitrary>], iteration_bounds = array<i64: 2, 3, 1>, scalar_prefetch = 0 : i64, scratch_operands = 1 : i64, tpu.core_type = #tpu.core_type<tc>, window_params = [{transform_indices = @transform_0, window_bounds = array<i64: 256, 256>}, {transform_indices = @transform_1, window_bounds = array<i64: 256, 256>}, {transform_indices = @transform_2, window_bounds = array<i64: 256, 256>}]} {
    %c0_i32 = arith.constant 0 : i32
    %0 = arith.cmpi eq, %arg2, %c0_i32 : i32
    %1 = arith.extui %0 : i1 to i32
    %c0_i32_0 = arith.constant 0 : i32
    %2 = arith.cmpi ne, %1, %c0_i32_0 : i32
    scf.if %2 {
      %cst_10 = arith.constant 0.000000e+00 : f32
      %12 = vector.broadcast %cst_10 : f32 to vector<256x256xf32>
      %c0_11 = arith.constant 0 : index
      %c0_12 = arith.constant 0 : index
      %13 = vector.load %arg6[%c0_11, %c0_12] : memref<256x256xf32, #tpu.memory_space<vmem>>, vector<256x256xf32>
      tpu.vector_store %arg6[%c0_11, %c0_12], %12 {strides = array<i32>} : memref<256x256xf32, #tpu.memory_space<vmem>>, vector<256x256xf32>,
    } else {
    }
    %c0 = arith.constant 0 : index
    %c0_1 = arith.constant 0 : index
    %3 = vector.load %arg6[%c0, %c0_1] : memref<256x256xf32, #tpu.memory_space<vmem>>, vector<256x256xf32>
    %c0_2 = arith.constant 0 : index
    %c0_3 = arith.constant 0 : index
    %4 = vector.load %arg3[%c0_2, %c0_3] : memref<256x256xf32, #tpu.memory_space<vmem>>, vector<256x256xf32>
    %c0_4 = arith.constant 0 : index
    %c0_5 = arith.constant 0 : index
    %5 = vector.load %arg4[%c0_4, %c0_5] : memref<256x256xf32, #tpu.memory_space<vmem>>, vector<256x256xf32>
    %cst = arith.constant dense<0.000000e+00> : vector<256x256xf32>
    %6 = tpu.matmul %4, %5, %cst {dimension_numbers = #tpu.dot_dimension_numbers<[1], [0], [0], [1], [0, 0, 1, 1], [], []>} : vector<256x256xf32>, vector<256x256xf32>, vector<256x256xf32> -> vector<256x256xf32>
    %7 = arith.addf %3, %6 : vector<256x256xf32>
    %c0_6 = arith.constant 0 : index
    %c0_7 = arith.constant 0 : index
    %8 = vector.load %arg6[%c0_6, %c0_7] : memref<256x256xf32, #tpu.memory_space<vmem>>, vector<256x256xf32>
    tpu.vector_store %arg6[%c0_6, %c0_7], %7 {strides = array<i32>} : memref<256x256xf32, #tpu.memory_space<vmem>>, vector<256x256xf32>,
    %c0_i32_8 = arith.constant 0 : i32
    %9 = arith.cmpi eq, %arg2, %c0_i32_8 : i32
    %10 = arith.extui %9 : i1 to i32
    %c0_i32_9 = arith.constant 0 : i32
    %11 = arith.cmpi ne, %10, %c0_i32_9 : i32
    scf.if %11 {
      %c0_10 = arith.constant 0 : index
      %c0_11 = arith.constant 0 : index
      %12 = vector.load %arg6[%c0_10, %c0_11] : memref<256x256xf32, #tpu.memory_space<vmem>>, vector<256x256xf32>
      %c0_12 = arith.constant 0 : index
      %c0_13 = arith.constant 0 : index
      %13 = vector.load %arg5[%c0_12, %c0_13] : memref<256x256xf32, #tpu.memory_space<vmem>>, vector<256x256xf32>
      tpu.vector_store %arg5[%c0_12, %c0_13], %12 {strides = array<i32>} : memref<256x256xf32, #tpu.memory_space<vmem>>, vector<256x256xf32>,
    } else {
    }
    return
  }
  func.func @transform_0(%arg0: i32, %arg1: i32, %arg2: i32) -> (i32, i32) {
    %c0_i32 = arith.constant 0 : i32
    return %arg0, %arg2 : i32, i32
  }
  func.func @transform_1(%arg0: i32, %arg1: i32, %arg2: i32) -> (i32, i32) {
    %c0_i32 = arith.constant 0 : i32
    return %arg2, %arg1 : i32, i32
  }
  func.func @transform_2(%arg0: i32, %arg1: i32, %arg2: i32) -> (i32, i32) {
    %c0_i32 = arith.constant 0 : i32
    return %arg0, %arg1 : i32, i32
  }
}

</mosaic_0001>

<bundles_post_ra>
// kernel: tpu_custom_call.1
= control target key start
LH: loop header
LB: loop body
LE: loop exit
PB: predicated region body
PF: predicated region fallthrough
CT: control target
= control target key end

     0   :  { %s2099_s0 = inlined_call_operand.hbm [shape: f32[512,256], index: 0, kind: input, shape index: {}]   ;;  %s2100_s1 = inlined_call_operand.hbm [shape: f32[256,768], index: 1, kind: input, shape index: {}]   ;;  %s2101_s2 = inlined_call_operand.hbm [shape: f32[512,768], index: 2, kind: output, shape index: {}]  }
   0x1   :  { %2111 = sst [smem:[#allocation18_spill]] %s2099_s0 }
   0x2   :  { %2112 = sst [smem:[#allocation19_spill]] %s2101_s2 }
   0x3   :  { %7 = vsyncpa [#allocation4], 0 }
   0x4   :  { %9 = vsyncpa [#allocation4 + $0x1], 0 }
   0x5   :  { %10 = vsyncpa [#allocation7], 0 }
   0x6   :  { %12 = vsyncpa [#allocation7 + $0x1], 0 }
   0x7   :  { %13 = vsyncpa [#allocation5], 0 }
   0x8   :  { %15 = vsyncpa [#allocation5 + $0x1], 0  ;;  %s1608_s9 = smov 0   ;;  %s1610_s10 = smov 0  }
   0x9   :  { %s1612_s11 = smov 0   ;;  %s1614_s12 = smov 0  }
   0xa   :  { %s1616_s13 = smov 0   ;;  %s1618_s14 = smov 0  }
   0xb   :  { %s1620_s15 = smov 0   ;;  %s1622_s16 = smov 0  }
   0xc   :  { %s1624_s17 = smov 0   ;;  %s1626_s18 = smov 0  }
   0xd   :  { %s1628_s19 = smov 0   ;;  %s1630_s20 = smov 0  }
   0xe   :  { %s1632_s21 = smov 0   ;;  %s1634_s22 = smov 0  }
   0xf LB: > { %2113 = sst [smem:[#allocation12_spill]] %s1566_s18  ;;  %s1151_s23 = sadd.s32 4294967295, %s1582_s22   ;;  %s1582_s22 = sphi %s1634_s22, %s21_s22   ;;  %s1578_s21 = sphi %s1632_s21, %s2143_s21   ;;  %s1574_s20 = sphi %s1630_s20, %s2154_s20   ;;  %s1570_s19 = sphi %s1628_s19, %s2141_s19   ;;  %s1566_s18 = sphi %s1626_s18, %s2153_s18   ;;  %s1562_s17 = sphi %s1624_s17, %s2152_s17   ;;  %s1558_s16 = sphi %s1622_s16, %s2151_s16   ;;  %s1554_s15 = sphi %s1620_s15, %s2150_s15   ;;  %s1550_s14 = sphi %s1618_s14, %s2149_s14   ;;  %s1546_s13 = sphi %s1616_s13, %s2148_s13   ;;  %s1542_s12 = sphi %s1614_s12, %s2147_s12   ;;  %s1538_s11 = sphi %s1612_s11, %s2146_s11   ;;  %s1534_s10 = sphi %s1610_s10, %s2145_s10   ;;  %s1530_s9 = sphi %s1608_s9, %s2144_s9  }
  0x10   : > { %2114 = sst [smem:[#allocation13_spill]] %s1578_s21  ;;  %p56_p0 = scmp.ne.s32.totalorder %s1562_s17, %s1558_s16 }
  0x11   : > { %p57_p1 = scmp.eq.s32.totalorder %s1582_s22, 0  ;;  %p62_p2 = scmp.ne.s32.totalorder %s1558_s16, %s1554_s15 }
  0x12   : > { %p1683_p3 = scmp.eq.s32.totalorder %s1151_s23, 0  ;;  %p1687_p4 = scmp.eq.s32.totalorder %s1151_s23, 5 }
  0x13   : > { %p58_p5 = por %p57_p1, %p56_p0  ;;  %p1258_p7 = scmp.lt.s32.totalorder %s1582_s22, 6 }
  0x14   : > { %p1695_p6 = por %p1683_p3, %p62_p2  ;;  %s142_s29 = sand.u32 1, %s1562_s17  }
  0x15   : > { %s1174_s30 = sshll.u32 %s1578_s21, 13  ;;  %s1155_s3 = sshll.u32 %s142_s29, 9 }
  0x16   : > { %s2118_s0 = sld [smem:[#allocation18_spill]]  ;;  %s146_s7 = scalar_lea.vmem [#allocation3], %s1155_s3 }
  0x17   : > { %s156_s8 = sshll.u32 %s146_s7, 4  ;;  %p1707_p8 = pnand %p1258_p7, %p58_p5  ;;  %s157_s8 = int_to_ptr.vmem [resolvable:$true] %s156_s8 }
  0x18   : > { %s143_s23 = scalar_lea.sflag [#allocation4], %s142_s29  ;;  %s1391_s25 = scalar_lea.vmem %s157_s8, 8192 }
  0x19   : > { %p1380_p9 = pneg %p1707_p8  ;;  %p1392_p10 = scmp.ne.s32.totalorder %s157_s8, %s1391_s25 }
  0x1a   : > { %s1584_s24 = smov [#allocation3]  }
  0x1b   : > { %p1394_p11 = pnand %p1392_p10, %p1380_p9  ;;  %s1396_s2 = sshll.u32 %s1584_s24, 4  ;;  %s1397_s2 = int_to_ptr.vmem [resolvable:$false] %s1396_s2 }
  0x1c   : > { %s155_s6 = scalar_lea.hbm %s2118_s0, %s1174_s30  ;;  %s1398_s30 = scalar_lea.vmem %s1397_s2, 16384 }
  0x1d   : > { %p1395_p12 = pneg %p1394_p11  ;;  %p1399_p13 = scmp.lt.s32.totalorder %s157_s8, %s1397_s2 }
  0x1e   : > { %p1400_p0 = scmp.lt.s32.totalorder %s1398_s30, %s1391_s25 }
  0x20   : > { %p1401_p2 = por %p1400_p0, %p1399_p13 }
  0x22   : > { %p1402_p5 = pnand %p1401_p2, %p1395_p12 }
  0x24   : > { %1405 = shalt.err (!%p1402_p5)
}
  0x25   : > { %s2103_s3 = smov 256   ;;  %s2104_s2 = smov 16  }
  0x26   : > { %1250 = dma.hbm_to_vmem [thread:$0]  (!%p1707_p8), %s155_s6, 8192, %s157_s8, %s143_s23, %s2103_s3, %s2103_s3, %s2104_s2  }
  0x27   : > { %p1162_p9 = scmp.ge.s32.totalorder %s1582_s22, 1  ;;  %p188_p10 = scmp.lt.s32.totalorder %s1582_s22, 7 }
  0x28   : > { %s1152_s25 = sadd.s32 4294967294, %s1582_s22   ;;  %s36_s29 = sadd.s32 1, %s1574_s20 }
  0x29   : > { %p1720_p11 = pnand %p1162_p9, %p188_p10  ;;  %s77_s4 = sadd.s32 1, %s1550_s14 }
  0x2a   : > { %p38_p12 = scmp.ge.s32.totalorder %s36_s29, 3  ;;  %p84_p13 = scmp.ne.s32.totalorder %s1550_s14, %s1546_s13 }
  0x2b   : > { %p90_p0 = scmp.ne.s32.totalorder %s1546_s13, %s1542_s12  ;;  %s105_s5 = sadd.s32 1, %s1538_s11 }
  0x2c   : > { %s2156_s29 = smov (%p38_p12, %s36_s29), 0  ;;  %s2122_s6 = sadd.s32 1, %s1578_s21 }
  0x2d   : > { %2121 = sst [smem:[#allocation14_spill]] %s2156_s29  ;;  %s2158_s6 = smov (!%p38_p12, %s2122_s6), %s1578_s21 }
  0x2e   : > { %s73_s7 = ssub.s32 %s1574_s20, %s2156_s29  ;;  %p1741_p8 = por %p84_p13, %p57_p1 }
  0x2f   : > { %p42_p2 = scmp.ge.s32.totalorder %s2158_s6, 2  ;;  %p75_p5 = scmp.eq.s32.totalorder %s73_s7, 0 }
  0x30   : > { %p1747_p9 = por %p90_p0, %p1683_p3  ;;  %p115_p10 = scmp.ne.s32.totalorder %s1538_s11, %s1534_s10 }
  0x31   : > { %s2160_s6 = smov (%p42_p2, %s2158_s6), 0  ;;  %p121_p13 = scmp.ne.s32.totalorder %s1534_s10, %s1530_s9 }
  0x32   : > { %2125 = sst [smem:[#allocation15_spill]] %s2160_s6  ;;  %s44_s23 = ssub.s32 %s1578_s21, %s2160_s6 }
  0x33   : > { %s1756_s15 = scalar_select %p75_p5, %s1550_s14, %s77_s4  }
  0x34   : > { %p1762_p1 = por %p1687_p4, %p115_p10  ;;  %p47_p12 = scmp.eq.s32.totalorder %s44_s23, 0 }
  0x35   : > { %2126 = sst [smem:[#allocation16_spill]] %s1756_s15  ;;  %s102_s26 = sor.u32 %s73_s7, %s44_s23 }
  0x36   : > { %s2127_s30 = scalar_select %p1762_p1, 1, 0 }
  0x37   : > { %p103_p3 = scmp.eq.s32.totalorder %s102_s26, 0  ;;  %s2129_s3 = sadd.s32 1, %s1562_s17 }
  0x38   : > { %2128 = sst [smem:[#allocation17_spill]] %s2127_s30  ;;  %p122_p0 = scmp.eq.s32.totalorder %s1152_s25, 5 }
  0x39   : > { %s1771_s2 = scalar_select %p47_p12, %s1562_s17, %s2129_s3  }
  0x3a   : > { %s1774_s0 = scalar_select %p103_p3, %s1538_s11, %s105_s5  }
  0x3b   : > { %s166_s4 = sand.u32 1, %s1550_s14   ;;  %p1777_p2 = por %p122_p0, %p121_p13 }
  0x3c   : > { %s1159_s29 = sshll.u32 %s166_s4, 9  ;;  %s1175_s6 = sshll.u32 %s1574_s20, 8 }
  0x3d   : > { %s2130_s27 = scalar_select %p1777_p2, 1, 0 }
  0x3e   : > { %s170_s21 = scalar_lea.vmem [#allocation6], %s1159_s29  ;;  %s179_s7 = scalar_lea.hbm %s2100_s1, %s1175_s6 }
  0x3f   : > { %s180_s15 = sshll.u32 %s170_s21, 4  ;;  %p1789_p4 = pnand %p1258_p7, %p1741_p8  ;;  %s181_s15 = int_to_ptr.vmem [resolvable:$true] %s180_s15 }
  0x40   : > { %s167_s25 = scalar_lea.sflag [#allocation7], %s166_s4  ;;  %s1419_s5 = scalar_lea.vmem %s181_s15, 8192 }
  0x41   : > { %p1408_p5 = pneg %p1789_p4  ;;  %p1420_p10 = scmp.ne.s32.totalorder %s181_s15, %s1419_s5 }
  0x42   : > { %s1587_s21 = smov [#allocation6]  }
  0x43   : > { %p1422_p12 = pnand %p1420_p10, %p1408_p5  ;;  %s1424_s29 = sshll.u32 %s1587_s21, 4  ;;  %s1425_s29 = int_to_ptr.vmem [resolvable:$false] %s1424_s29 }
  0x44   : > { %s1426_s18 = scalar_lea.vmem %s1425_s29, 16384  ;;  %p1427_p13 = scmp.lt.s32.totalorder %s181_s15, %s1425_s29 }
  0x45   : > { %p1423_p3 = pneg %p1422_p12  ;;  %p1428_p0 = scmp.lt.s32.totalorder %s1426_s18, %s1419_s5 }
  0x47   : > { %p1429_p2 = por %p1428_p0, %p1427_p13 }
  0x49   : > { %p1430_p1 = pnand %p1429_p2, %p1423_p3 }
  0x4b   : > { %1433 = shalt.err (!%p1430_p1)
}
  0x4c   : > { %s1588_s6 = smov 768   ;;  %s2132_s8 = smov 16  }
  0x4d   : > { %s2133_s23 = smov 256   ;;  %192 = sbr.rel (%p1720_p11) target bundleno = 423 (0x1a7), region = 28 }
  0x4e   : > { %1253 = dma.hbm_to_vmem [thread:$0]  (!%p1789_p4), %s179_s7, 8192, %s181_s15, %s167_s25, %s1588_s6, %s2133_s23, %s2132_s8  }
  0x4f   : > { %s194_s30 = sand.u32 (!%p1720_p11), 1, %s1558_s16  }
  0x50   : > { %s1163_s26 = sshll.u32 (!%p1720_p11), %s194_s30, 9  ;;  %s195_s4 = scalar_lea.sflag (!%p1720_p11), [#allocation4], %s194_s30 }
  0x51   : > { %s1802_s21 = scalar_lea.vmem (!%p1720_p11), [#allocation3], %s1163_s26 }
  0x52   : > { %1517 = dma.done.wait (%p1695_p6), %s195_s4, 8192  }
  0x53   : > { %1519 = vsyncadd (%p1695_p6), %s195_s4, 4294959104  ;;  %s203_s3 = sand.u32 1, %s1546_s13  }
  0x54   : > { %s1164_s5 = sshll.u32 %s203_s3, 9  ;;  %s204_s15 = scalar_lea.sflag [#allocation7], %s203_s3 }
  0x55   : > { %s1809_s7 = scalar_lea.vmem [#allocation6], %s1164_s5 }
  0x56   : > { %1521 = dma.done.wait (%p1747_p9), %s204_s15, 8192  }
  0x57   : > { %1523 = vsyncadd (%p1747_p9), %s204_s15, 4294959104  ;;  %v466_v0 = vld [vmem:[%s1809_s7 + $0xf8] sm:$0xff]  ;;  %v465_v1 = vld [vmem:[%s1809_s7 + $0xf0] sm:$0xff]  ;;  %s230_s28 = sand.u32 1, %s1534_s10   ;;  %s2134_s25 = sld [smem:[#allocation12_spill]] }
  0x58   : > { %v464_v2 = vld [vmem:[%s1809_s7 + $0xe8] sm:$0xff]  ;;  %499 = vmatprep.subr.mxu0 %v466_v0  ;;  %1176 = vmatprep.subr.mxu1 %v466_v0  ;;  %v463_v3 = vld [vmem:[%s1809_s7 + $0xe0] sm:$0xff]  ;;  %v462_v4 = vld [vmem:[%s1809_s7 + $0xd8] sm:$0xff]  ;;  %s1165_s24 = sshll.u32 %s230_s28, 9  ;;  %s1240_s29 = smul.u32 192, %s1570_s19 }
  0x59   : > { %500 = vmatpush1.msra.mxu0 %v465_v1  ;;  %1208 = vmatpush1.msra.mxu1 %v465_v1  ;;  %v461_v5 = vld [vmem:[%s1809_s7 + $0xd0] sm:$0xff]  ;;  %v460_v6 = vld [vmem:[%s1809_s7 + $0xc8] sm:$0xff]  ;;  %v459_v7 = vld [vmem:[%s1809_s7 + $0xc0] sm:$0xff]  ;;  %s1946_s12 = scalar_lea.vmem [#allocation8], %s1165_s24  ;;  %s2135_s23 = sld [smem:[#allocation17_spill]] }
  0x5a   : > { %501 = vmatprep.subr.mxu0 %v464_v2  ;;  %1177 = vmatprep.subr.mxu1 %v464_v2  ;;  %v458_v8 = vld [vmem:[%s1809_s7 + $0xb8] sm:$0xff]  ;;  %v457_v9 = vld [vmem:[%s1809_s7 + $0xb0] sm:$0xff]  ;;  %v456_v10 = vld [vmem:[%s1809_s7 + $0xa8] sm:$0xff]  ;;  %s1032_s8 = sshll.u32 %s1946_s12, 4  ;;  %s2136_s4 = sld [smem:[#allocation19_spill]]  ;;  %s2016_s8 = int_to_ptr.vmem [resolvable:$true] %s1032_s8 }
  0x5b   : > { %502 = vmatpush1.msra.mxu0 %v463_v3  ;;  %1209 = vmatpush1.msra.mxu1 %v463_v3  ;;  %v455_v11 = vld [vmem:[%s1809_s7 + $0xa0] sm:$0xff]  ;;  %v454_v12 = vld [vmem:[%s1809_s7 + $0x98] sm:$0xff]  ;;  %v453_v13 = vld [vmem:[%s1809_s7 + $0x90] sm:$0xff]  ;;  %s2024_s3 = scalar_lea.sflag [#allocation5], %s230_s28  ;;  %s1434_s5 = scalar_lea.vmem %s2016_s8, 8192 }
  0x5c   : > { %503 = vmatprep.subr.mxu0 %v462_v4  ;;  %1178 = vmatprep.subr.mxu1 %v462_v4  ;;  %v452_v14 = vld [vmem:[%s1809_s7 + $0x88] sm:$0xff]  ;;  %v451_v15 = vld [vmem:[%s1809_s7 + $0x80] sm:$0xff]  ;;  %v450_v16 = vld [vmem:[%s1809_s7 + $0x78] sm:$0xff]  ;;  %p1435_p6 = scmp.ne.s32.totalorder %s2016_s8, %s1434_s5  ;;  %s1589_s15 = smov [#allocation8]  }
  0x5d   : > { %504 = vmatpush1.msra.mxu0 %v461_v5  ;;  %1210 = vmatpush1.msra.mxu1 %v461_v5  ;;  %v449_v17 = vld [vmem:[%s1809_s7 + $0x70] sm:$0xff]  ;;  %v448_v18 = vld [vmem:[%s1809_s7 + $0x68] sm:$0xff]  ;;  %v447_v19 = vld [vmem:[%s1809_s7 + $0x60] sm:$0xff]  ;;  %s1168_s18 = sshll.u32 %s2134_s25, 1 }
  0x5e   : > { %505 = vmatprep.subr.mxu0 %v460_v6  ;;  %1179 = vmatprep.subr.mxu1 %v460_v6  ;;  %v446_v20 = vld [vmem:[%s1809_s7 + $0x58] sm:$0xff]  ;;  %v445_v21 = vld [vmem:[%s1809_s7 + $0x50] sm:$0xff]  ;;  %v444_v22 = vld [vmem:[%s1809_s7 + $0x48] sm:$0xff]  ;;  %s1029_s6 = sadd.s32 %s1240_s29, %s1168_s18 }
  0x5f   : > { %506 = vmatpush1.msra.mxu0 %v459_v7  ;;  %1211 = vmatpush1.msra.mxu1 %v459_v7  ;;  %v443_v23 = vld [vmem:[%s1809_s7 + $0x40] sm:$0xff]  ;;  %v442_v24 = vld [vmem:[%s1809_s7 + $0x38] sm:$0xff]  ;;  %v441_v25 = vld [vmem:[%s1809_s7 + $0x30] sm:$0xff]  ;;  %s1170_s19 = sshll.u32 %s1029_s6, 7  ;;  %p2137_p7 = scmp.ne.s32.totalorder %s2135_s23, 0 }
  0x60   : > { %507 = vmatprep.subr.mxu0 %v458_v8  ;;  %1180 = vmatprep.subr.mxu1 %v458_v8  ;;  %v440_v26 = vld [vmem:[%s1809_s7 + $0x28] sm:$0xff]  ;;  %v439_v27 = vld [vmem:[%s1809_s7 + $0x20] sm:$0xff]  ;;  %v438_v28 = vld [vmem:[%s1809_s7 + $0x18] sm:$0xff] }
  0x61   : > { %508 = vmatpush1.msra.mxu0 %v457_v9  ;;  %1212 = vmatpush1.msra.mxu1 %v457_v9  ;;  %v437_v29 = vld [vmem:[%s1809_s7 + $0x10] sm:$0xff]  ;;  %v436_v30 = vld [vmem:[%s1809_s7 + $0x8] sm:$0xff]  ;;  %v435_v31 = vld [vmem:[%s1809_s7] sm:$0xff]  ;;  %p1436_p11 = pnand %p1435_p6, %p2137_p7 }
  0x62   : > { %509 = vmatprep.subr.mxu0 %v456_v10  ;;  %1181 = vmatprep.subr.mxu1 %v456_v10  ;;  %v498_v32 = vld [vmem:[%s1809_s7 + $0x1f8] sm:$0xff]  ;;  %v497_v33 = vld [vmem:[%s1809_s7 + $0x1f0] sm:$0xff]  ;;  %v496_v34 = vld [vmem:[%s1809_s7 + $0x1e8] sm:$0xff] }
  0x63   : > { %510 = vmatpush1.msra.mxu0 %v455_v11  ;;  %1213 = vmatpush1.msra.mxu1 %v455_v11  ;;  %v495_v35 = vld [vmem:[%s1809_s7 + $0x1e0] sm:$0xff]  ;;  %v494_v36 = vld [vmem:[%s1809_s7 + $0x1d8] sm:$0xff]  ;;  %v493_v37 = vld [vmem:[%s1809_s7 + $0x1d0] sm:$0xff]  ;;  %p1437_p8 = pneg %p1436_p11 }
  0x64   : > { %511 = vmatprep.subr.mxu0 %v454_v12  ;;  %1182 = vmatprep.subr.mxu1 %v454_v12  ;;  %v492_v38 = vld [vmem:[%s1809_s7 + $0x1c8] sm:$0xff]  ;;  %v491_v39 = vld [vmem:[%s1809_s7 + $0x1c0] sm:$0xff]  ;;  %v490_v40 = vld [vmem:[%s1809_s7 + $0x1b8] sm:$0xff] }
  0x65   : > { %512 = vmatpush1.msra.mxu0 %v453_v13  ;;  %1214 = vmatpush1.msra.mxu1 %v453_v13  ;;  %v489_v41 = vld [vmem:[%s1809_s7 + $0x1b0] sm:$0xff]  ;;  %v488_v42 = vld [vmem:[%s1809_s7 + $0x1a8] sm:$0xff]  ;;  %v487_v43 = vld [vmem:[%s1809_s7 + $0x1a0] sm:$0xff] }
  0x66   : > { %513 = vmatprep.subr.mxu0 %v452_v14  ;;  %1183 = vmatprep.subr.mxu1 %v452_v14  ;;  %v486_v44 = vld [vmem:[%s1809_s7 + $0x198] sm:$0xff]  ;;  %v485_v45 = vld [vmem:[%s1809_s7 + $0x190] sm:$0xff]  ;;  %v484_v46 = vld [vmem:[%s1809_s7 + $0x188] sm:$0xff] }
  0x67   : > { %514 = vmatpush1.msra.mxu0 %v451_v15  ;;  %1215 = vmatpush1.msra.mxu1 %v451_v15  ;;  %v483_v47 = vld [vmem:[%s1809_s7 + $0x180] sm:$0xff]  ;;  %v482_v48 = vld [vmem:[%s1809_s7 + $0x178] sm:$0xff]  ;;  %v481_v49 = vld [vmem:[%s1809_s7 + $0x170] sm:$0xff] }
  0x68   : > { %515 = vmatprep.subr.mxu0 %v450_v16  ;;  %1184 = vmatprep.subr.mxu1 %v450_v16  ;;  %v480_v50 = vld [vmem:[%s1809_s7 + $0x168] sm:$0xff]  ;;  %v479_v51 = vld [vmem:[%s1809_s7 + $0x160] sm:$0xff]  ;;  %v478_v52 = vld [vmem:[%s1809_s7 + $0x158] sm:$0xff] }
  0x69   : > { %516 = vmatpush1.msra.mxu0 %v449_v17  ;;  %1216 = vmatpush1.msra.mxu1 %v449_v17  ;;  %v477_v53 = vld [vmem:[%s1809_s7 + $0x150] sm:$0xff]  ;;  %v476_v54 = vld [vmem:[%s1809_s7 + $0x148] sm:$0xff]  ;;  %v475_v55 = vld [vmem:[%s1809_s7 + $0x140] sm:$0xff] }
  0x6a   : > { %517 = vmatprep.subr.mxu0 %v448_v18  ;;  %1185 = vmatprep.subr.mxu1 %v448_v18  ;;  %v474_v56 = vld [vmem:[%s1809_s7 + $0x138] sm:$0xff]  ;;  %v473_v57 = vld [vmem:[%s1809_s7 + $0x130] sm:$0xff]  ;;  %v472_v58 = vld [vmem:[%s1809_s7 + $0x128] sm:$0xff] }
  0x6b   : > { %518 = vmatpush1.msra.mxu0 %v447_v19  ;;  %1217 = vmatpush1.msra.mxu1 %v447_v19  ;;  %v471_v59 = vld [vmem:[%s1809_s7 + $0x120] sm:$0xff]  ;;  %v470_v60 = vld [vmem:[%s1809_s7 + $0x118] sm:$0xff]  ;;  %v469_v61 = vld [vmem:[%s1809_s7 + $0x110] sm:$0xff] }
  0x6c   : > { %519 = vmatprep.subr.mxu0 %v446_v20  ;;  %1186 = vmatprep.subr.mxu1 %v446_v20  ;;  %v468_v62 = vld [vmem:[%s1809_s7 + $0x108] sm:$0xff]  ;;  %v467_v63 = vld [vmem:[%s1809_s7 + $0x100] sm:$0xff]  ;;  %v374_v4 = vld [vmem:[%s1802_s21 + $0x18] sm:$0xff]  ;;  %s1438_s7 = sshll.u32 %s1589_s15, 4  ;;  %s1439_s7 = int_to_ptr.vmem [resolvable:$false] %s1438_s7 }
  0x6d   : > { %520 = vmatpush1.msra.mxu0 %v445_v21  ;;  %1218 = vmatpush1.msra.mxu1 %v445_v21  ;;  %v372_v0 = vld [vmem:[%s1802_s21 + $0x8] sm:$0xff]  ;;  %v371_v2 = vld [vmem:[%s1802_s21] sm:$0xff]  ;;  %v406_v5 = vld [vmem:[%s1802_s21 + $0x118] sm:$0xff]  ;;  %s1440_s24 = scalar_lea.vmem %s1439_s7, 16384  ;;  %p1441_p9 = scmp.lt.s32.totalorder %s2016_s8, %s1439_s7 }
  0x6e   : > { %521 = vmatprep.subr.mxu0 %v444_v22  ;;  %1187 = vmatprep.subr.mxu1 %v444_v22  ;;  %v404_v1 = vld [vmem:[%s1802_s21 + $0x108] sm:$0xff]  ;;  %v403_v3 = vld [vmem:[%s1802_s21 + $0x100] sm:$0xff]  ;;  %v373_v6 = vld [vmem:[%s1802_s21 + $0x10] sm:$0xff]  ;;  %p1442_p1 = scmp.lt.s32.totalorder %s1440_s24, %s1434_s5 }
  0x6f   : > { %522 = vmatpush1.msra.mxu0 %v443_v23  ;;  %1219 = vmatpush1.msra.mxu1 %v443_v23  ;;  %v405_v7 = vld [vmem:[%s1802_s21 + $0x110] sm:$0xff]  ;;  %v376_v8 = vld [vmem:[%s1802_s21 + $0x28] sm:$0xff]  ;;  %v375_v10 = vld [vmem:[%s1802_s21 + $0x20] sm:$0xff] }
  0x70   : > { %523 = vmatprep.subr.mxu0 %v442_v24  ;;  %1188 = vmatprep.subr.mxu1 %v442_v24  ;;  %v408_v9 = vld [vmem:[%s1802_s21 + $0x128] sm:$0xff]  ;;  %v407_v11 = vld [vmem:[%s1802_s21 + $0x120] sm:$0xff]  ;;  %v378_v12 = vld [vmem:[%s1802_s21 + $0x38] sm:$0xff]  ;;  %p1443_p2 = por %p1442_p1, %p1441_p9 }
  0x71   : > { %524 = vmatpush1.msra.mxu0 %v441_v25  ;;  %1220 = vmatpush1.msra.mxu1 %v441_v25  ;;  %v410_v13 = vld [vmem:[%s1802_s21 + $0x138] sm:$0xff]  ;;  %v377_v14 = vld [vmem:[%s1802_s21 + $0x30] sm:$0xff]  ;;  %v380_v16 = vld [vmem:[%s1802_s21 + $0x48] sm:$0xff] }
  0x72   : > { %525 = vmatprep.subr.mxu0 %v440_v26  ;;  %1189 = vmatprep.subr.mxu1 %v440_v26  ;;  %v409_v15 = vld [vmem:[%s1802_s21 + $0x130] sm:$0xff]  ;;  %v412_v17 = vld [vmem:[%s1802_s21 + $0x148] sm:$0xff]  ;;  %v379_v18 = vld [vmem:[%s1802_s21 + $0x40] sm:$0xff]  ;;  %p1444_p4 = pnand %p1443_p2, %p1437_p8 }
  0x73   : > { %526 = vmatpush1.msra.mxu0 %v439_v27  ;;  %1221 = vmatpush1.msra.mxu1 %v439_v27  ;;  %v411_v19 = vld [vmem:[%s1802_s21 + $0x140] sm:$0xff]  ;;  %v382_v20 = vld [vmem:[%s1802_s21 + $0x58] sm:$0xff]  ;;  %v381_v22 = vld [vmem:[%s1802_s21 + $0x50] sm:$0xff] }
  0x74   : > { %527 = vmatprep.subr.mxu0 %v438_v28  ;;  %1190 = vmatprep.subr.mxu1 %v438_v28  ;;  %v414_v21 = vld [vmem:[%s1802_s21 + $0x158] sm:$0xff]  ;;  %v413_v23 = vld [vmem:[%s1802_s21 + $0x150] sm:$0xff]  ;;  %v384_v24 = vld [vmem:[%s1802_s21 + $0x68] sm:$0xff] }
  0x75   : > { %528 = vmatpush1.msra.mxu0 %v437_v29  ;;  %1222 = vmatpush1.msra.mxu1 %v437_v29  ;;  %v416_v25 = vld [vmem:[%s1802_s21 + $0x168] sm:$0xff]  ;;  %v383_v26 = vld [vmem:[%s1802_s21 + $0x60] sm:$0xff]  ;;  %v386_v28 = vld [vmem:[%s1802_s21 + $0x78] sm:$0xff] }
  0x76   : > { %529 = vmatprep.subr.mxu0 %v436_v30  ;;  %1191 = vmatprep.subr.mxu1 %v436_v30  ;;  %v415_v27 = vld [vmem:[%s1802_s21 + $0x160] sm:$0xff]  ;;  %v418_v29 = vld [vmem:[%s1802_s21 + $0x178] sm:$0xff]  ;;  %v385_v30 = vld [vmem:[%s1802_s21 + $0x70] sm:$0xff] }
  0x77   : > { %530 = vmatpush1.msra.mxu0 %v435_v31  ;;  %1223 = vmatpush1.msra.mxu1 %v435_v31  ;;  %v417_v31 = vld [vmem:[%s1802_s21 + $0x170] sm:$0xff] }
  0x78   : > { %531 = vmatprep.subr.mxu0 %v498_v32  ;;  %1192 = vmatprep.subr.mxu1 %v498_v32  ;;  %v388_v32 = vld [vmem:[%s1802_s21 + $0x88] sm:$0xff] }
  0x79   : > { %532 = vmatpush2.msra.mxu0 %v497_v33  ;;  %1224 = vmatpush2.msra.mxu1 %v497_v33  ;;  %v420_v33 = vld [vmem:[%s1802_s21 + $0x188] sm:$0xff] }
  0x7a   : > { %533 = vmatprep.subr.mxu0 %v496_v34  ;;  %1193 = vmatprep.subr.mxu1 %v496_v34  ;;  %v387_v34 = vld [vmem:[%s1802_s21 + $0x80] sm:$0xff] }
  0x7b   : > { %534 = vmatpush2.msra.mxu0 %v495_v35  ;;  %1225 = vmatpush2.msra.mxu1 %v495_v35  ;;  %v419_v35 = vld [vmem:[%s1802_s21 + $0x180] sm:$0xff] }
  0x7c   : > { %535 = vmatprep.subr.mxu0 %v494_v36  ;;  %1194 = vmatprep.subr.mxu1 %v494_v36  ;;  %v390_v36 = vld [vmem:[%s1802_s21 + $0x98] sm:$0xff] }
  0x7d   : > { %536 = vmatpush2.msra.mxu0 %v493_v37  ;;  %1226 = vmatpush2.msra.mxu1 %v493_v37  ;;  %v422_v37 = vld [vmem:[%s1802_s21 + $0x198] sm:$0xff] }
  0x7e   : > { %537 = vmatprep.subr.mxu0 %v492_v38  ;;  %1195 = vmatprep.subr.mxu1 %v492_v38  ;;  %v389_v38 = vld [vmem:[%s1802_s21 + $0x90] sm:$0xff] }
  0x7f   : > { %538 = vmatpush2.msra.mxu0 %v491_v39  ;;  %1227 = vmatpush2.msra.mxu1 %v491_v39  ;;  %v421_v39 = vld [vmem:[%s1802_s21 + $0x190] sm:$0xff] }
  0x80   : > { %539 = vmatprep.subr.mxu0 %v490_v40  ;;  %1196 = vmatprep.subr.mxu1 %v490_v40  ;;  %v392_v40 = vld [vmem:[%s1802_s21 + $0xa8] sm:$0xff] }
  0x81   : > { %540 = vmatpush2.msra.mxu0 %v489_v41  ;;  %1228 = vmatpush2.msra.mxu1 %v489_v41  ;;  %v424_v41 = vld [vmem:[%s1802_s21 + $0x1a8] sm:$0xff] }
  0x82   : > { %541 = vmatprep.subr.mxu0 %v488_v42  ;;  %1197 = vmatprep.subr.mxu1 %v488_v42  ;;  %v391_v42 = vld [vmem:[%s1802_s21 + $0xa0] sm:$0xff] }
  0x83   : > { %542 = vmatpush2.msra.mxu0 %v487_v43  ;;  %1229 = vmatpush2.msra.mxu1 %v487_v43  ;;  %v423_v43 = vld [vmem:[%s1802_s21 + $0x1a0] sm:$0xff] }
  0x84   : > { %543 = vmatprep.subr.mxu0 %v486_v44  ;;  %1198 = vmatprep.subr.mxu1 %v486_v44  ;;  %v394_v44 = vld [vmem:[%s1802_s21 + $0xb8] sm:$0xff] }
  0x85   : > { %544 = vmatpush2.msra.mxu0 %v485_v45  ;;  %1230 = vmatpush2.msra.mxu1 %v485_v45  ;;  %v426_v45 = vld [vmem:[%s1802_s21 + $0x1b8] sm:$0xff] }
  0x86   : > { %545 = vmatprep.subr.mxu0 %v484_v46  ;;  %1199 = vmatprep.subr.mxu1 %v484_v46  ;;  %v393_v46 = vld [vmem:[%s1802_s21 + $0xb0] sm:$0xff] }
  0x87   : > { %546 = vmatpush2.msra.mxu0 %v483_v47  ;;  %1231 = vmatpush2.msra.mxu1 %v483_v47  ;;  %v425_v47 = vld [vmem:[%s1802_s21 + $0x1b0] sm:$0xff] }
  0x88   : > { %547 = vmatprep.subr.mxu0 %v482_v48  ;;  %1200 = vmatprep.subr.mxu1 %v482_v48  ;;  %v396_v48 = vld [vmem:[%s1802_s21 + $0xc8] sm:$0xff] }
  0x89   : > { %548 = vmatpush2.msra.mxu0 %v481_v49  ;;  %1232 = vmatpush2.msra.mxu1 %v481_v49  ;;  %v428_v49 = vld [vmem:[%s1802_s21 + $0x1c8] sm:$0xff] }
  0x8a   : > { %549 = vmatprep.subr.mxu0 %v480_v50  ;;  %1201 = vmatprep.subr.mxu1 %v480_v50  ;;  %v395_v50 = vld [vmem:[%s1802_s21 + $0xc0] sm:$0xff] }
  0x8b   : > { %550 = vmatpush2.msra.mxu0 %v479_v51  ;;  %1233 = vmatpush2.msra.mxu1 %v479_v51  ;;  %v427_v51 = vld [vmem:[%s1802_s21 + $0x1c0] sm:$0xff] }
  0x8c   : > { %551 = vmatprep.subr.mxu0 %v478_v52  ;;  %1202 = vmatprep.subr.mxu1 %v478_v52  ;;  %v398_v52 = vld [vmem:[%s1802_s21 + $0xd8] sm:$0xff] }
  0x8d   : > { %552 = vmatpush2.msra.mxu0 %v477_v53  ;;  %1234 = vmatpush2.msra.mxu1 %v477_v53  ;;  %v430_v53 = vld [vmem:[%s1802_s21 + $0x1d8] sm:$0xff] }
  0x8e   : > { %553 = vmatprep.subr.mxu0 %v476_v54  ;;  %1203 = vmatprep.subr.mxu1 %v476_v54  ;;  %v397_v54 = vld [vmem:[%s1802_s21 + $0xd0] sm:$0xff] }
  0x8f   : > { %554 = vmatpush2.msra.mxu0 %v475_v55  ;;  %1235 = vmatpush2.msra.mxu1 %v475_v55  ;;  %v429_v55 = vld [vmem:[%s1802_s21 + $0x1d0] sm:$0xff] }
  0x90   : > { %555 = vmatprep.subr.mxu0 %v474_v56  ;;  %1204 = vmatprep.subr.mxu1 %v474_v56  ;;  %v400_v56 = vld [vmem:[%s1802_s21 + $0xe8] sm:$0xff] }
  0x91   : > { %556 = vmatpush2.msra.mxu0 %v473_v57  ;;  %1236 = vmatpush2.msra.mxu1 %v473_v57  ;;  %v432_v57 = vld [vmem:[%s1802_s21 + $0x1e8] sm:$0xff] }
  0x92   : > { %557 = vmatprep.subr.mxu0 %v472_v58  ;;  %1205 = vmatprep.subr.mxu1 %v472_v58  ;;  %v399_v58 = vld [vmem:[%s1802_s21 + $0xe0] sm:$0xff] }
  0x93   : > { %558 = vmatpush2.msra.mxu0 %v471_v59  ;;  %1237 = vmatpush2.msra.mxu1 %v471_v59  ;;  %v431_v59 = vld [vmem:[%s1802_s21 + $0x1e0] sm:$0xff] }
  0x94   : > { %559 = vmatprep.subr.mxu0 %v470_v60  ;;  %1206 = vmatprep.subr.mxu1 %v470_v60  ;;  %v402_v60 = vld [vmem:[%s1802_s21 + $0xf8] sm:$0xff] }
  0x95   : > { %560 = vmatpush2.msra.mxu0 %v469_v61  ;;  %1238 = vmatpush2.msra.mxu1 %v469_v61  ;;  %v434_v61 = vld [vmem:[%s1802_s21 + $0x1f8] sm:$0xff] }
  0x96   : > { %561 = vmatprep.subr.mxu0 %v468_v62  ;;  %1207 = vmatprep.subr.mxu1 %v468_v62  ;;  %v401_v62 = vld [vmem:[%s1802_s21 + $0xf0] sm:$0xff] }
  0x97   : > { %562 = vmatpush2.msra.mxu0 %v467_v63  ;;  %1239 = vmatpush2.msra.mxu1 %v467_v63  ;;  %v433_v63 = vld [vmem:[%s1802_s21 + $0x1f0] sm:$0xff]  ;;  %s2014_s21 = scalar_lea.hbm %s2136_s4, %s1170_s19 }
  0x98   : > { %563 = vmatprep.mubr.f32.mxu0 %v372_v0  ;;  %659 = vmatprep.mubr.f32.mxu1 %v404_v1 }
  0x99   : > { %564 = vmatmul.mubr.f32.vlgmr.msra.gmra.mxu0 %v371_v2  ;;  %660 = vmatmul.mubr.f32.vlgmr.msra.gmra.mxu1 %v403_v3 }
  0x9a   : > { %569 = vmatprep.mubr.f32.mxu0 %v374_v4  ;;  %665 = vmatprep.mubr.f32.mxu1 %v406_v5 }
  0x9d   : > { %570 = vmatmul.mubr.f32.gmra.mxu0 %v373_v6  ;;  %666 = vmatmul.mubr.f32.gmra.mxu1 %v405_v7 }
  0x9e   : > { %575 = vmatprep.mubr.f32.mxu0 %v376_v8  ;;  %671 = vmatprep.mubr.f32.mxu1 %v408_v9 }
  0xa1   : > { %576 = vmatmul.mubr.f32.gmra.mxu0 %v375_v10  ;;  %672 = vmatmul.mubr.f32.gmra.mxu1 %v407_v11 }
  0xa2   : > { %581 = vmatprep.mubr.f32.mxu0 %v378_v12  ;;  %677 = vmatprep.mubr.f32.mxu1 %v410_v13 }
  0xa5   : > { %582 = vmatmul.mubr.f32.gmra.mxu0 %v377_v14  ;;  %678 = vmatmul.mubr.f32.gmra.mxu1 %v409_v15 }
  0xa6   : > { %587 = vmatprep.mubr.f32.mxu0 %v380_v16  ;;  %683 = vmatprep.mubr.f32.mxu1 %v412_v17 }
  0xa9   : > { %588 = vmatmul.mubr.f32.gmra.mxu0 %v379_v18  ;;  %684 = vmatmul.mubr.f32.gmra.mxu1 %v411_v19 }
  0xaa   : > { %593 = vmatprep.mubr.f32.mxu0 %v382_v20  ;;  %689 = vmatprep.mubr.f32.mxu1 %v414_v21 }
  0xad   : > { %594 = vmatmul.mubr.f32.gmra.mxu0 %v381_v22  ;;  %690 = vmatmul.mubr.f32.gmra.mxu1 %v413_v23 }
  0xae   : > { %599 = vmatprep.mubr.f32.mxu0 %v384_v24  ;;  %695 = vmatprep.mubr.f32.mxu1 %v416_v25 }
  0xb1   : > { %600 = vmatmul.mubr.f32.gmra.mxu0 %v383_v26  ;;  %696 = vmatmul.mubr.f32.gmra.mxu1 %v415_v27 }
  0xb2   : > { %605 = vmatprep.mubr.f32.mxu0 %v386_v28  ;;  %701 = vmatprep.mubr.f32.mxu1 %v418_v29 }
  0xb5   : > { %606 = vmatmul.mubr.f32.gmra.mxu0 %v385_v30  ;;  %702 = vmatmul.mubr.f32.gmra.mxu1 %v417_v31 }
  0xb6   : > { %611 = vmatprep.mubr.f32.mxu0 %v388_v32  ;;  %707 = vmatprep.mubr.f32.mxu1 %v420_v33 }
  0xb9   : > { %612 = vmatmul.mubr.f32.gmra.mxu0 %v387_v34  ;;  %708 = vmatmul.mubr.f32.gmra.mxu1 %v419_v35 }
  0xba   : > { %617 = vmatprep.mubr.f32.mxu0 %v390_v36  ;;  %713 = vmatprep.mubr.f32.mxu1 %v422_v37 }
  0xbd   : > { %618 = vmatmul.mubr.f32.gmra.mxu0 %v389_v38  ;;  %714 = vmatmul.mubr.f32.gmra.mxu1 %v421_v39 }
  0xbe   : > { %623 = vmatprep.mubr.f32.mxu0 %v392_v40  ;;  %719 = vmatprep.mubr.f32.mxu1 %v424_v41 }
  0xc1   : > { %624 = vmatmul.mubr.f32.gmra.mxu0 %v391_v42  ;;  %720 = vmatmul.mubr.f32.gmra.mxu1 %v423_v43 }
  0xc2   : > { %629 = vmatprep.mubr.f32.mxu0 %v394_v44  ;;  %725 = vmatprep.mubr.f32.mxu1 %v426_v45 }
  0xc5   : > { %630 = vmatmul.mubr.f32.gmra.mxu0 %v393_v46  ;;  %726 = vmatmul.mubr.f32.gmra.mxu1 %v425_v47 }
  0xc6   : > { %635 = vmatprep.mubr.f32.mxu0 %v396_v48  ;;  %731 = vmatprep.mubr.f32.mxu1 %v428_v49 }
  0xc9   : > { %636 = vmatmul.mubr.f32.gmra.mxu0 %v395_v50  ;;  %732 = vmatmul.mubr.f32.gmra.mxu1 %v427_v51 }
  0xca   : > { %641 = vmatprep.mubr.f32.mxu0 %v398_v52  ;;  %737 = vmatprep.mubr.f32.mxu1 %v430_v53 }
  0xcd   : > { %642 = vmatmul.mubr.f32.gmra.mxu0 %v397_v54  ;;  %738 = vmatmul.mubr.f32.gmra.mxu1 %v429_v55 }
  0xce   : > { %647 = vmatprep.mubr.f32.mxu0 %v400_v56  ;;  %743 = vmatprep.mubr.f32.mxu1 %v432_v57 }
  0xd1   : > { %648 = vmatmul.mubr.f32.gmra.mxu0 %v399_v58  ;;  %744 = vmatmul.mubr.f32.gmra.mxu1 %v431_v59 }
  0xd2   : > { %653 = vmatprep.mubr.f32.mxu0 %v402_v60  ;;  %749 = vmatprep.mubr.f32.mxu1 %v434_v61 }
  0xd5   : > { %654 = vmatmul.mubr.f32.gmra.mxu0 %v401_v62  ;;  %750 = vmatmul.mubr.f32.gmra.mxu1 %v433_v63 }
 0x159   : > { %v565_v0 = vpop.f32.mrf.mxu0  ;;  %v661_v1 = vpop.f32.mrf.mxu1 }
 0x15a   : > { %951 = vst [vmem:[%s1946_s12] sm:$0xff] %v565_v0  ;;  %983 = vst [vmem:[%s1946_s12 + $0x100] sm:$0xff] %v661_v1 }
 0x15b   : > { %v567_v2 = vpop.f32.mrf.mxu0  ;;  %v663_v3 = vpop.f32.mrf.mxu1 }
 0x15c   : > { %952 = vst [vmem:[%s1946_s12 + $0x8] sm:$0xff] %v567_v2  ;;  %984 = vst [vmem:[%s1946_s12 + $0x108] sm:$0xff] %v663_v3 }
 0x15d   : > { %v571_v4 = vpop.f32.mrf.mxu0  ;;  %v667_v5 = vpop.f32.mrf.mxu1 }
 0x15e   : > { %953 = vst [vmem:[%s1946_s12 + $0x10] sm:$0xff] %v571_v4  ;;  %985 = vst [vmem:[%s1946_s12 + $0x110] sm:$0xff] %v667_v5 }
 0x15f   : > { %v573_v6 = vpop.f32.mrf.mxu0  ;;  %v669_v7 = vpop.f32.mrf.mxu1 }
 0x160   : > { %954 = vst [vmem:[%s1946_s12 + $0x18] sm:$0xff] %v573_v6  ;;  %986 = vst [vmem:[%s1946_s12 + $0x118] sm:$0xff] %v669_v7 }
 0x161   : > { %v577_v8 = vpop.f32.mrf.mxu0  ;;  %v673_v9 = vpop.f32.mrf.mxu1 }
 0x162   : > { %955 = vst [vmem:[%s1946_s12 + $0x20] sm:$0xff] %v577_v8  ;;  %987 = vst [vmem:[%s1946_s12 + $0x120] sm:$0xff] %v673_v9 }
 0x163   : > { %v579_v10 = vpop.f32.mrf.mxu0  ;;  %v675_v11 = vpop.f32.mrf.mxu1 }
 0x164   : > { %956 = vst [vmem:[%s1946_s12 + $0x28] sm:$0xff] %v579_v10  ;;  %988 = vst [vmem:[%s1946_s12 + $0x128] sm:$0xff] %v675_v11 }
 0x165   : > { %v583_v12 = vpop.f32.mrf.mxu0  ;;  %v679_v13 = vpop.f32.mrf.mxu1 }
 0x166   : > { %957 = vst [vmem:[%s1946_s12 + $0x30] sm:$0xff] %v583_v12  ;;  %989 = vst [vmem:[%s1946_s12 + $0x130] sm:$0xff] %v679_v13 }
 0x167   : > { %v585_v14 = vpop.f32.mrf.mxu0  ;;  %v681_v15 = vpop.f32.mrf.mxu1 }
 0x168   : > { %958 = vst [vmem:[%s1946_s12 + $0x38] sm:$0xff] %v585_v14  ;;  %990 = vst [vmem:[%s1946_s12 + $0x138] sm:$0xff] %v681_v15 }
 0x169   : > { %v589_v16 = vpop.f32.mrf.mxu0  ;;  %v685_v17 = vpop.f32.mrf.mxu1 }
 0x16a   : > { %959 = vst [vmem:[%s1946_s12 + $0x40] sm:$0xff] %v589_v16  ;;  %991 = vst [vmem:[%s1946_s12 + $0x140] sm:$0xff] %v685_v17 }
 0x16b   : > { %v591_v18 = vpop.f32.mrf.mxu0  ;;  %v687_v19 = vpop.f32.mrf.mxu1 }
 0x16c   : > { %960 = vst [vmem:[%s1946_s12 + $0x48] sm:$0xff] %v591_v18  ;;  %992 = vst [vmem:[%s1946_s12 + $0x148] sm:$0xff] %v687_v19 }
 0x16d   : > { %v595_v20 = vpop.f32.mrf.mxu0  ;;  %v691_v21 = vpop.f32.mrf.mxu1 }
 0x16e   : > { %961 = vst [vmem:[%s1946_s12 + $0x50] sm:$0xff] %v595_v20  ;;  %993 = vst [vmem:[%s1946_s12 + $0x150] sm:$0xff] %v691_v21 }
 0x16f   : > { %v597_v22 = vpop.f32.mrf.mxu0  ;;  %v693_v23 = vpop.f32.mrf.mxu1 }
 0x170   : > { %962 = vst [vmem:[%s1946_s12 + $0x58] sm:$0xff] %v597_v22  ;;  %994 = vst [vmem:[%s1946_s12 + $0x158] sm:$0xff] %v693_v23 }
 0x171   : > { %v601_v24 = vpop.f32.mrf.mxu0  ;;  %v697_v25 = vpop.f32.mrf.mxu1 }
 0x172   : > { %963 = vst [vmem:[%s1946_s12 + $0x60] sm:$0xff] %v601_v24  ;;  %995 = vst [vmem:[%s1946_s12 + $0x160] sm:$0xff] %v697_v25 }
 0x173   : > { %v603_v26 = vpop.f32.mrf.mxu0  ;;  %v699_v27 = vpop.f32.mrf.mxu1 }
 0x174   : > { %964 = vst [vmem:[%s1946_s12 + $0x68] sm:$0xff] %v603_v26  ;;  %996 = vst [vmem:[%s1946_s12 + $0x168] sm:$0xff] %v699_v27 }
 0x175   : > { %v607_v28 = vpop.f32.mrf.mxu0  ;;  %v703_v29 = vpop.f32.mrf.mxu1 }
 0x176   : > { %965 = vst [vmem:[%s1946_s12 + $0x70] sm:$0xff] %v607_v28  ;;  %997 = vst [vmem:[%s1946_s12 + $0x170] sm:$0xff] %v703_v29 }
 0x177   : > { %v609_v30 = vpop.f32.mrf.mxu0  ;;  %v705_v31 = vpop.f32.mrf.mxu1 }
 0x178   : > { %966 = vst [vmem:[%s1946_s12 + $0x78] sm:$0xff] %v609_v30  ;;  %998 = vst [vmem:[%s1946_s12 + $0x178] sm:$0xff] %v705_v31 }
 0x179   : > { %v613_v32 = vpop.f32.mrf.mxu0  ;;  %v709_v33 = vpop.f32.mrf.mxu1 }
 0x17a   : > { %967 = vst [vmem:[%s1946_s12 + $0x80] sm:$0xff] %v613_v32  ;;  %999 = vst [vmem:[%s1946_s12 + $0x180] sm:$0xff] %v709_v33 }
 0x17b   : > { %v615_v34 = vpop.f32.mrf.mxu0  ;;  %v711_v35 = vpop.f32.mrf.mxu1 }
 0x17c   : > { %968 = vst [vmem:[%s1946_s12 + $0x88] sm:$0xff] %v615_v34  ;;  %1000 = vst [vmem:[%s1946_s12 + $0x188] sm:$0xff] %v711_v35 }
 0x17d   : > { %v619_v36 = vpop.f32.mrf.mxu0  ;;  %v715_v37 = vpop.f32.mrf.mxu1 }
 0x17e   : > { %969 = vst [vmem:[%s1946_s12 + $0x90] sm:$0xff] %v619_v36  ;;  %1001 = vst [vmem:[%s1946_s12 + $0x190] sm:$0xff] %v715_v37 }
 0x17f   : > { %v621_v38 = vpop.f32.mrf.mxu0  ;;  %v717_v39 = vpop.f32.mrf.mxu1 }
 0x180   : > { %970 = vst [vmem:[%s1946_s12 + $0x98] sm:$0xff] %v621_v38  ;;  %1002 = vst [vmem:[%s1946_s12 + $0x198] sm:$0xff] %v717_v39 }
 0x181   : > { %v625_v40 = vpop.f32.mrf.mxu0  ;;  %v721_v41 = vpop.f32.mrf.mxu1 }
 0x182   : > { %971 = vst [vmem:[%s1946_s12 + $0xa0] sm:$0xff] %v625_v40  ;;  %1003 = vst [vmem:[%s1946_s12 + $0x1a0] sm:$0xff] %v721_v41 }
 0x183   : > { %v627_v42 = vpop.f32.mrf.mxu0  ;;  %v723_v43 = vpop.f32.mrf.mxu1 }
 0x184   : > { %972 = vst [vmem:[%s1946_s12 + $0xa8] sm:$0xff] %v627_v42  ;;  %1004 = vst [vmem:[%s1946_s12 + $0x1a8] sm:$0xff] %v723_v43 }
 0x185   : > { %v631_v44 = vpop.f32.mrf.mxu0  ;;  %v727_v45 = vpop.f32.mrf.mxu1 }
 0x186   : > { %973 = vst [vmem:[%s1946_s12 + $0xb0] sm:$0xff] %v631_v44  ;;  %1005 = vst [vmem:[%s1946_s12 + $0x1b0] sm:$0xff] %v727_v45 }
 0x187   : > { %v633_v46 = vpop.f32.mrf.mxu0  ;;  %v729_v47 = vpop.f32.mrf.mxu1 }
 0x188   : > { %974 = vst [vmem:[%s1946_s12 + $0xb8] sm:$0xff] %v633_v46  ;;  %1006 = vst [vmem:[%s1946_s12 + $0x1b8] sm:$0xff] %v729_v47 }
 0x189   : > { %v637_v48 = vpop.f32.mrf.mxu0  ;;  %v733_v49 = vpop.f32.mrf.mxu1 }
 0x18a   : > { %975 = vst [vmem:[%s1946_s12 + $0xc0] sm:$0xff] %v637_v48  ;;  %1007 = vst [vmem:[%s1946_s12 + $0x1c0] sm:$0xff] %v733_v49 }
 0x18b   : > { %v639_v50 = vpop.f32.mrf.mxu0  ;;  %v735_v51 = vpop.f32.mrf.mxu1 }
 0x18c   : > { %976 = vst [vmem:[%s1946_s12 + $0xc8] sm:$0xff] %v639_v50  ;;  %1008 = vst [vmem:[%s1946_s12 + $0x1c8] sm:$0xff] %v735_v51 }
 0x18d   : > { %v643_v52 = vpop.f32.mrf.mxu0  ;;  %v739_v53 = vpop.f32.mrf.mxu1 }
 0x18e   : > { %977 = vst [vmem:[%s1946_s12 + $0xd0] sm:$0xff] %v643_v52  ;;  %1009 = vst [vmem:[%s1946_s12 + $0x1d0] sm:$0xff] %v739_v53 }
 0x18f   : > { %v645_v54 = vpop.f32.mrf.mxu0  ;;  %v741_v55 = vpop.f32.mrf.mxu1 }
 0x190   : > { %978 = vst [vmem:[%s1946_s12 + $0xd8] sm:$0xff] %v645_v54  ;;  %1010 = vst [vmem:[%s1946_s12 + $0x1d8] sm:$0xff] %v741_v55 }
 0x191   : > { %v649_v56 = vpop.f32.mrf.mxu0  ;;  %v745_v57 = vpop.f32.mrf.mxu1 }
 0x192   : > { %979 = vst [vmem:[%s1946_s12 + $0xe0] sm:$0xff] %v649_v56  ;;  %1011 = vst [vmem:[%s1946_s12 + $0x1e0] sm:$0xff] %v745_v57 }
 0x193   : > { %v651_v58 = vpop.f32.mrf.mxu0  ;;  %v747_v59 = vpop.f32.mrf.mxu1 }
 0x194   : > { %980 = vst [vmem:[%s1946_s12 + $0xe8] sm:$0xff] %v651_v58  ;;  %1012 = vst [vmem:[%s1946_s12 + $0x1e8] sm:$0xff] %v747_v59 }
 0x195   : > { %v655_v60 = vpop.f32.mrf.mxu0  ;;  %v751_v61 = vpop.f32.mrf.mxu1 }
 0x196   : > { %981 = vst [vmem:[%s1946_s12 + $0xf0] sm:$0xff] %v655_v60  ;;  %1013 = vst [vmem:[%s1946_s12 + $0x1f0] sm:$0xff] %v751_v61 }
 0x197   : > { %v657_v62 = vpop.f32.mrf.mxu0  ;;  %v753_v63 = vpop.f32.mrf.mxu1 }
 0x198   : > { %982 = vst [vmem:[%s1946_s12 + $0xf8] sm:$0xff] %v657_v62  ;;  %1014 = vst [vmem:[%s1946_s12 + $0x1f8] sm:$0xff] %v753_v63 }
 0x199   : > { %1447 = shalt.err (!%p1444_p4)
}
 0x19a   : > { %s1448_s28 = scalar_lea.hbm %s2014_s21, 8192  ;;  %s1452_s29 = scalar_lea.hbm %s2136_s4, 49152 }
 0x19b   : > { %p1449_p5 = scmp.ne.s32.totalorder %s2014_s21, %s1448_s28  ;;  %p1453_p3 = scmp.lt.s32.totalorder %s2014_s21, %s2136_s4 }
 0x19c   : > { %p1454_p13 = scmp.lt.s32.totalorder %s1452_s29, %s1448_s28 }
 0x19d   : > { %p1450_p10 = pnand %p1449_p5, %p2137_p7 }
 0x19e   : > { %p1455_p0 = por %p1454_p13, %p1453_p3 }
 0x19f   : > { %p1451_p12 = pneg %p1450_p10 }
 0x1a1   : > { %p1456_p6 = pnand %p1455_p0, %p1451_p12 }
 0x1a3   : > { %1459 = shalt.err (!%p1456_p6)
}
 0x1a4   : > { %s1590_s19 = smov 256   ;;  %s1591_s30 = smov 768  }
 0x1a5   : > { %s1592_s26 = smov 16  }
 0x1a6   : > { %1245 = dma.vmem_to_hbm [thread:$0]  (%p2137_p7), %s2016_s8, 8192, %s2014_s21, %s2024_s3, %s1590_s19, %s1591_s30, %s1592_s26  }
 0x1a7 PF: > { %p1259_p11 = scmp.ge.s32.totalorder %s1582_s22, 2  ;;  %s1047_s5 = sand.u32 1, %s1530_s9  }
 0x1a8   : > { %p2138_p8 = scmp.ne.s32.totalorder %s2130_s27, 0  ;;  %s1048_s15 = scalar_lea.sflag [#allocation5], %s1047_s5 }
 0x1aa   : > { %p1255_p9 = pnand %p1259_p11, %p2138_p8 }
 0x1ac   : > { %p1256_p1 = pneg %p1255_p9 }
 0x1ae   : > { %1525 = dma.done.wait (%p1256_p1), %s1048_s15, 8192  }
 0x1af   : > { %1527 = vsyncadd (%p1256_p1), %s1048_s15, 4294959104  ;;  %s21_s22 = sadd.s32 1, %s1582_s22   ;;  %s2140_s8 = sld [smem:[#allocation16_spill]] }
 0x1b0   : > { %p2052_p2 = scmp.ge.s32.totalorder %s21_s22, 8   ;;  %s2141_s19 = sld [smem:[#allocation13_spill]] }
 0x1b1   : > { %s2142_s27 = sld [smem:[#allocation14_spill]]  ;;  %s2144_s9 = smov %s1534_s10 }
 0x1b2   : > { %s2143_s21 = sld [smem:[#allocation15_spill]]  ;;  %s2145_s10 = smov %s1538_s11 }
 0x1b3   : > { %s2146_s11 = smov %s1774_s0  ;;  %s2147_s12 = smov %s1546_s13 }
 0x1b4   : > { %s2148_s13 = smov %s1550_s14  ;;  %s2150_s15 = smov %s1558_s16 }
 0x1b5   : > { %s2149_s14 = smov %s2140_s8  ;;  %s2151_s16 = smov %s1562_s17 }
 0x1b6   : > { %s2152_s17 = smov %s1771_s2  ;;  %s2153_s18 = smov %s1574_s20 }
 0x1b7   : > { %s2154_s20 = smov %s2142_s27  ;;  %20 = sbr.rel (!%p2052_p2) target bundleno = 15 (0xf), region = 94 }
 0x1bc   :  { %1053 = vsyncpa [#allocation4], 1 }
 0x1bd   :  { %1055 = vsyncpa [#allocation4 + $0x1], 1 }
 0x1be   :  { %1056 = vsyncpa [#allocation7], 1 }
 0x1bf   :  { %1058 = vsyncpa [#allocation7 + $0x1], 1 }
 0x1c0   :  { %1059 = vsyncpa [#allocation5], 1 }
 0x1c1   :  { %1061 = vsyncpa [#allocation5 + $0x1], 1 }

</bundles_post_ra>
